<compile_context>
chip_gen: v7x
topology: tpu7x:2x2x1
jax: 0.10.0
libtpu: 0.0.40
codegen_flags: <defaults>
</compile_context>

<pallas_src>
import functools

import numpy as np
import jax
import jax.numpy as jnp
from jax.experimental import pallas as pl
from jax.experimental.pallas import tpu as pltpu


def sigmoid_rampup(current, rampup_length):
    """Exponential rampup (host-side scalar, identical to the PyTorch helper)."""
    if rampup_length == 0:
        return 1.0
    current = np.clip(current, 0.0, rampup_length)
    phase = 1.0 - current / rampup_length
    return float(np.exp(-5.0 * phase * phase))


def _round_up(x, m):
    return ((x + m - 1) // m) * m


def _tpu_config():
    """(vmem_capacity_bytes, tensorcore_count) with conservative fallbacks.

    Fallbacks assume v7x (64 MiB VMEM, 2 TCs): a wrong '2' on a 1-TC chip costs
    at most one masked tile; a wrong small VMEM just means slightly smaller tiles.
    """
    vmem_cap = 64 * 1024 * 1024
    cores = 2
    try:
        info = pltpu.get_tpu_info()
        cap = getattr(info, "vmem_capacity_bytes", None)
        if cap:
            vmem_cap = int(cap)
        for attr in ("num_cores", "core_count", "num_tensorcores", "tensorcore_count"):
            v = getattr(info, attr, None)
            if v:
                cores = int(v)
                break
    except Exception:
        pass
    cores = max(1, min(int(cores), 8))
    return vmem_cap, cores


def _elr_plus_kernel(coef_ref, logits_ref, labels_ref, q_ref, out_ref, acc_ref,
                     *, n_rows, tile_rows, t_per_part, inv_n):
    # coef_ref:   SMEM (1,) f32 (scalar prefetch) -- sigmoid_rampup(iter)*_lambda
    # logits_ref: VMEM (TN, C)     -- raw model outputs (f32 or bf16)
    # labels_ref: VMEM (TN, 1) i32 -- integer class labels
    # q_ref:      VMEM (TN, C)     -- ELR target distribution q
    # out_ref:    VMEM (1, 8, 128) f32 -- per-core partial loss (broadcast-filled)
    # acc_ref:    VMEM (1, 1) f32  -- running sum over this core's tiles
    p = pl.program_id(0)
    t = pl.program_id(1)
    n_t = pl.num_programs(1)

    @pl.when(t == 0)
    def _():
        acc_ref[...] = jnp.zeros_like(acc_ref)

    logits = logits_ref[...].astype(jnp.float32)                 # (TN, C)

    # numerically-stable softmax pieces (no materialized one-hot / log_softmax)
    m = jnp.max(logits, axis=-1, keepdims=True)                  # (TN, 1)
    shifted = logits - m
    e = jnp.exp(shifted)
    s = jnp.sum(e, axis=-1, keepdims=True)                       # (TN, 1)
    inv_s = pl.reciprocal(s)                                     # exact (EUP slot)
    log_s = jnp.log(s)

    # cross-entropy per row: log(sum exp) - shifted[label]  (iota-compare select)
    labels = labels_ref[...]                                     # (TN, 1) i32
    classes = jax.lax.broadcasted_iota(jnp.int32, logits.shape, 1)
    picked = jnp.sum(jnp.where(classes == labels, shifted, 0.0),
                     axis=-1, keepdims=True)                     # (TN, 1)
    ce_row = log_s - picked

    # ELR regularizer per row
    y_pred = jnp.clip(e * inv_s, 1e-4, 1.0 - 1e-4)
    inner = jnp.sum(q_ref[...].astype(jnp.float32) * y_pred,
                    axis=-1, keepdims=True)                      # (TN, 1)
    reg_row = jnp.log(1.0 - inner)

    # select-mask rows past the real batch: covers the partial trailing block and
    # clamped extra tiles; NaN/Inf on garbage rows is discarded by the select.
    row0 = (p * t_per_part + t) * tile_rows
    rows = jax.lax.broadcasted_iota(jnp.int32, (logits.shape[0], 1), 0) + row0
    coef = coef_ref[0]
    contrib = jnp.where(rows < n_rows, ce_row + coef * reg_row, 0.0)
    acc_ref[...] += jnp.sum(contrib, keepdims=True)              # (1, 1)

    @pl.when(t == n_t - 1)
    def _():
        val = acc_ref[...] * inv_n                               # (1, 1)
        out_ref[...] = jnp.broadcast_to(val.reshape(1, 1, 1), out_ref.shape)


def elr_plus_loss(output, y_labeled, q, current_iter, _lambda=3.0, coef_step=0):
    """Pallas implementation of ELRPlus.forward (num_classes != 100 branch)."""
    n, c = output.shape
    coef = np.float32(sigmoid_rampup(current_iter, coef_step) * _lambda)
    coef_arr = jnp.asarray([coef], dtype=jnp.float32)
    labels2d = y_labeled.reshape(n, 1).astype(jnp.int32)

    vmem_cap, cores = _tpu_config()
    # v7x-safe by default; 64 MiB scoped limit on 128 MiB-VMEM chips (v5e/v6e/v5p).
    vmem_limit = (64 << 20) if vmem_cap >= (128 << 20) else (32 << 20)

    # tile-row budget from the lane-padded VMEM footprint (not HBM bytes): a
    # (tn, C) block occupies tn * roundup(C,128) lanes of VMEM per buffer.
    c_lanes = _round_up(max(c, 1), 128)
    bytes_per_row = (2 * c_lanes * output.dtype.itemsize   # logits, double buffered
                     + 2 * c_lanes * q.dtype.itemsize      # q, double buffered
                     + 2 * 128 * 4                         # labels (tn,1) i32, 2 buffers
                     + 10 * c_lanes * 4)                   # headroom for f32 body temps
    tn = int(0.7 * vmem_limit) // bytes_per_row
    tn = max(16, min((tn // 16) * 16, 8192))
    # keep every TensorCore busy when the batch allows it
    tn = min(tn, max(16, _round_up(-(-n // cores), 16)))

    num_tiles = -(-n // tn)                     # real blocks covering the n rows
    p_parts = max(1, min(cores, num_tiles))
    t_per_part = -(-num_tiles // p_parts)
    last_block = num_tiles - 1

    def _row_block(pp, tt, coef_ref):
        del coef_ref
        # clamp: extra logical tiles (from rounding tiles up to p_parts) re-read the
        # last real block; their rows are fully masked in-kernel, so no double count.
        return (jnp.minimum(pp * t_per_part + tt, last_block), 0)

    kernel = functools.partial(_elr_plus_kernel, n_rows=n, tile_rows=tn,
                               t_per_part=t_per_part, inv_n=float(1.0 / n))

    partials = pl.pallas_call(
        kernel,
        out_shape=jax.ShapeDtypeStruct((p_parts, 8, 128), jnp.float32),
        grid_spec=pltpu.PrefetchScalarGridSpec(
            num_scalar_prefetch=1,                       # coef
            grid=(p_parts, t_per_part),
            in_specs=[
                pl.BlockSpec((tn, c), _row_block),       # logits, last dim = full C
                pl.BlockSpec((tn, 1), _row_block),       # labels
                pl.BlockSpec((tn, c), _row_block),       # q
            ],
            out_specs=pl.BlockSpec((1, 8, 128), lambda pp, tt, coef: (pp, 0, 0)),
            scratch_shapes=[pltpu.VMEM((1, 1), jnp.float32)],
        ),
        compiler_params=pltpu.CompilerParams(
            dimension_semantics=("parallel", "arbitrary"),
            vmem_limit_bytes=vmem_limit,
        ),
    )(coef_arr, output, labels2d, q)

    return jnp.sum(partials[:, 0, 0])


def _reference_loss(output, y_labeled, q, coef, num_classes):
    """Pure-JAX reference mirroring the PyTorch forward."""
    output = output.astype(jnp.float32)
    q = q.astype(jnp.float32)
    y_pred = jax.nn.softmax(output, axis=1)
    y_pred = jnp.clip(y_pred, 1e-4, 1.0 - 1e-4)
    onehot = jax.nn.one_hot(y_labeled, num_classes, dtype=jnp.float32)
    ce = jnp.mean(-jnp.sum(onehot * jax.nn.log_softmax(output, axis=1), axis=-1))
    reg = jnp.mean(jnp.log(1.0 - jnp.sum(q * y_pred, axis=1)))
    return ce + coef * reg


if __name__ == "__main__":
    # TODO(synk): update_hist / pred_hist state and the num_classes==100 re-weighting
    # branch are outside this forward kernel; q is taken as an input.
    _lambda, beta, coef_step = 3.0, 0.3, 0
    current_iter = 5
    coef = sigmoid_rampup(current_iter, coef_step) * _lambda

    # --- small case consistent with the module: batch N=8, num_classes C=10 ---
    N, C = 8, 10
    key = jax.random.PRNGKey(0)
    k1, k2, k3 = jax.random.split(key, 3)
    output = jax.random.normal(k1, (N, C), dtype=jnp.float32) * 2.0
    y_labeled = jax.random.randint(k2, (N,), 0, C, dtype=jnp.int32)
    hist_logits = jax.random.normal(k3, (N, C), dtype=jnp.float32)
    q = (1.0 - beta) * jax.nn.softmax(hist_logits, axis=1)

    loss = jax.block_until_ready(
        elr_plus_loss(output, y_labeled, q, current_iter,
                      _lambda=_lambda, coef_step=coef_step))
    ref = jax.block_until_ready(_reference_loss(output, y_labeled, q, coef, C))
    assert np.isfinite(float(loss))
    np.testing.assert_allclose(np.asarray(loss), np.asarray(ref),
                               rtol=1e-5, atol=1e-5)

    # --- larger case: multi-tile batch grid, per-core partials, partial last block ---
    N2, C2 = 1100, 10
    k4, k5, k6 = jax.random.split(jax.random.PRNGKey(1), 3)
    output2 = jax.random.normal(k4, (N2, C2), dtype=jnp.float32) * 2.0
    y2 = jax.random.randint(k5, (N2,), 0, C2, dtype=jnp.int32)
    q2 = (1.0 - beta) * jax.nn.softmax(
        jax.random.normal(k6, (N2, C2), dtype=jnp.float32), axis=1)

    loss2 = jax.block_until_ready(
        elr_plus_loss(output2, y2, q2, current_iter,
                      _lambda=_lambda, coef_step=coef_step))
    ref2 = jax.block_until_ready(_reference_loss(output2, y2, q2, coef, C2))
    assert np.isfinite(float(loss2))
    np.testing.assert_allclose(np.asarray(loss2), np.asarray(ref2),
                               rtol=5e-5, atol=5e-5)

    # --- bf16 input storage (halves HBM traffic); arithmetic stays f32 in-kernel ---
    out_bf = output.astype(jnp.bfloat16)
    q_bf = q.astype(jnp.bfloat16)
    loss_bf = jax.block_until_ready(
        elr_plus_loss(out_bf, y_labeled, q_bf, current_iter,
                      _lambda=_lambda, coef_step=coef_step))
    ref_bf = jax.block_until_ready(_reference_loss(out_bf, y_labeled, q_bf, coef, C))
    assert np.isfinite(float(loss_bf))
    np.testing.assert_allclose(np.asarray(loss_bf), np.asarray(ref_bf),
                               rtol=1e-3, atol=1e-3)

    print("KERNEL_OK")
</pallas_src>

<mosaic_0001>
module attributes {stable_mosaic.version = 11 : i64} {
  func.func @_elr_plus_kernel(%arg0: i32, %arg1: i32, %arg2: memref<1xf32, #tpu.memory_space<smem>>, %arg3: memref<16x10xf32, #tpu.memory_space<vmem>>, %arg4: memref<16x1xi32, #tpu.memory_space<vmem>>, %arg5: memref<16x10xf32, #tpu.memory_space<vmem>>, %arg6: memref<1x8x128xf32, #tpu.memory_space<vmem>>, %arg7: memref<1x1xf32, #tpu.memory_space<vmem>>) attributes {dimension_semantics = [#tpu.dimension_semantics<parallel>, #tpu.dimension_semantics<arbitrary>], iteration_bounds = array<i64: 1, 1>, scalar_prefetch = 1 : i64, scratch_operands = 1 : i64, tpu.core_type = #tpu.core_type<tc>, window_params = [{transform_indices = @transform_0, window_bounds = array<i64: 16, 10>}, {transform_indices = @transform_1, window_bounds = array<i64: 16, 1>}, {transform_indices = @transform_2, window_bounds = array<i64: 16, 10>}, {transform_indices = @transform_3, window_bounds = array<i64: 1, 8, 128>}]} {
    %c0_i32 = arith.constant 0 : i32
    %0 = arith.cmpi eq, %arg1, %c0_i32 : i32
    %1 = arith.extui %0 : i1 to i32
    %c0_i32_0 = arith.constant 0 : i32
    %2 = arith.cmpi ne, %1, %c0_i32_0 : i32
    scf.if %2 {
      %cst_22 = arith.constant 0.000000e+00 : f32
      %60 = vector.broadcast %cst_22 : f32 to vector<1x1xf32>
      %c0_23 = arith.constant 0 : index
      %c0_24 = arith.constant 0 : index
      %61 = vector.load %arg7[%c0_23, %c0_24] : memref<1x1xf32, #tpu.memory_space<vmem>>, vector<1x1xf32>
      tpu.vector_store %arg7[%c0_23, %c0_24], %60 {strides = array<i32>} : memref<1x1xf32, #tpu.memory_space<vmem>>, vector<1x1xf32>,
    } else {
    }
    %c0 = arith.constant 0 : index
    %c0_1 = arith.constant 0 : index
    %3 = vector.load %arg3[%c0, %c0_1] : memref<16x10xf32, #tpu.memory_space<vmem>>, vector<16x10xf32>
    %cst = arith.constant dense<0xFF800000> : vector<16xf32>
    %4 = vector.multi_reduction <maximumf>, %3, %cst [1] : vector<16x10xf32> to vector<16xf32>
    %5 = vector.shape_cast %4 : vector<16xf32> to vector<16x1xf32>
    %6 = vector.broadcast %5 : vector<16x1xf32> to vector<16x10xf32>
    %7 = arith.subf %3, %6 : vector<16x10xf32>
    %8 = math.exp %7 : vector<16x10xf32>
    %cst_2 = arith.constant dense<0.000000e+00> : vector<16xf32>
    %9 = vector.multi_reduction <add>, %8, %cst_2 [1] : vector<16x10xf32> to vector<16xf32>
    %10 = vector.shape_cast %9 : vector<16xf32> to vector<16x1xf32>
    %11 = tpu.reciprocal %10 : vector<16x1xf32> -> vector<16x1xf32>
    %12 = math.log %10 : vector<16x1xf32>
    %c0_3 = arith.constant 0 : index
    %c0_4 = arith.constant 0 : index
    %13 = vector.load %arg4[%c0_3, %c0_4] : memref<16x1xi32, #tpu.memory_space<vmem>>, vector<16x1xi32>
    %14 = tpu.iota {dimensions = array<i32: 1>} : vector<16x10xi32>
    %15 = vector.broadcast %13 : vector<16x1xi32> to vector<16x10xi32>
    %16 = arith.cmpi eq, %14, %15 : vector<16x10xi32>
    %cst_5 = arith.constant 0.000000e+00 : f32
    %17 = vector.broadcast %cst_5 : f32 to vector<16x10xf32>
    %18 = arith.select %16, %7, %17 : vector<16x10xi1>, vector<16x10xf32>
    %cst_6 = arith.constant dense<0.000000e+00> : vector<16xf32>
    %19 = vector.multi_reduction <add>, %18, %cst_6 [1] : vector<16x10xf32> to vector<16xf32>
    %20 = vector.shape_cast %19 : vector<16xf32> to vector<16x1xf32>
    %21 = arith.subf %12, %20 : vector<16x1xf32>
    %22 = vector.broadcast %11 : vector<16x1xf32> to vector<16x10xf32>
    %23 = arith.mulf %8, %22 : vector<16x10xf32>
    %cst_7 = arith.constant 9.99999974E-5 : f32
    %cst_8 = arith.constant 0.999899983 : f32
    %24 = vector.broadcast %cst_7 : f32 to vector<16x10xf32>
    %25 = arith.maximumf %24, %23 : vector<16x10xf32>
    %26 = vector.broadcast %cst_8 : f32 to vector<16x10xf32>
    %27 = arith.minimumf %26, %25 : vector<16x10xf32>
    %c0_9 = arith.constant 0 : index
    %c0_10 = arith.constant 0 : index
    %28 = vector.load %arg5[%c0_9, %c0_10] : memref<16x10xf32, #tpu.memory_space<vmem>>, vector<16x10xf32>
    %29 = arith.mulf %28, %27 : vector<16x10xf32>
    %cst_11 = arith.constant dense<0.000000e+00> : vector<16xf32>
    %30 = vector.multi_reduction <add>, %29, %cst_11 [1] : vector<16x10xf32> to vector<16xf32>
    %31 = vector.shape_cast %30 : vector<16xf32> to vector<16x1xf32>
    %cst_12 = arith.constant 1.000000e+00 : f32
    %32 = vector.broadcast %cst_12 : f32 to vector<16x1xf32>
    %33 = arith.subf %32, %31 : vector<16x1xf32>
    %34 = math.log %33 : vector<16x1xf32>
    %c1_i32 = arith.constant 1 : i32
    %35 = arith.muli %arg0, %c1_i32 : i32
    %36 = arith.addi %35, %arg1 : i32
    %c16_i32 = arith.constant 16 : i32
    %37 = arith.muli %36, %c16_i32 : i32
    %38 = tpu.iota {dimensions = array<i32: 0>} : vector<16x1xi32>
    %39 = vector.broadcast %37 : i32 to vector<16x1xi32>
    %40 = arith.addi %38, %39 : vector<16x1xi32>
    %c0_13 = arith.constant 0 : index
    %41 = memref.load %arg2[%c0_13] : memref<1xf32, #tpu.memory_space<smem>>
    %c8_i32 = arith.constant 8 : i32
    %42 = vector.broadcast %c8_i32 : i32 to vector<16x1xi32>
    %43 = arith.cmpi slt, %40, %42 : vector<16x1xi32>
    %44 = vector.broadcast %41 : f32 to vector<16x1xf32>
    %45 = arith.mulf %44, %34 : vector<16x1xf32>
    %46 = arith.addf %21, %45 : vector<16x1xf32>
    %cst_14 = arith.constant 0.000000e+00 : f32
    %47 = vector.broadcast %cst_14 : f32 to vector<16x1xf32>
    %48 = arith.select %43, %46, %47 : vector<16x1xi1>, vector<16x1xf32>
    %c0_15 = arith.constant 0 : index
    %c0_16 = arith.constant 0 : index
    %49 = vector.load %arg7[%c0_15, %c0_16] : memref<1x1xf32, #tpu.memory_space<vmem>>, vector<1x1xf32>
    %50 = vector.shape_cast %48 : vector<16x1xf32> to vector<1x16x1xf32>
    %cst_17 = arith.constant dense<0.000000e+00> : vector<1xf32>
    %51 = vector.multi_reduction <add>, %50, %cst_17 [1, 2] : vector<1x16x1xf32> to vector<1xf32>
    %52 = vector.shape_cast %51 : vector<1xf32> to vector<1x1x1xf32>
    %53 = vector.extract %52[0, 0, 0] : f32 from vector<1x1x1xf32>
    %54 = vector.broadcast %53 : f32 to vector<1x1xf32>
    %55 = arith.addf %49, %54 : vector<1x1xf32>
    %c0_18 = arith.constant 0 : index
    %c0_19 = arith.constant 0 : index
    %56 = vector.load %arg7[%c0_18, %c0_19] : memref<1x1xf32, #tpu.memory_space<vmem>>, vector<1x1xf32>
    tpu.vector_store %arg7[%c0_18, %c0_19], %55 {strides = array<i32>} : memref<1x1xf32, #tpu.memory_space<vmem>>, vector<1x1xf32>,
    %c0_i32_20 = arith.constant 0 : i32
    %57 = arith.cmpi eq, %arg1, %c0_i32_20 : i32
    %58 = arith.extui %57 : i1 to i32
    %c0_i32_21 = arith.constant 0 : i32
    %59 = arith.cmpi ne, %58, %c0_i32_21 : i32
    scf.if %59 {
      %c0_22 = arith.constant 0 : index
      %c0_23 = arith.constant 0 : index
      %60 = vector.load %arg7[%c0_22, %c0_23] : memref<1x1xf32, #tpu.memory_space<vmem>>, vector<1x1xf32>
      %cst_24 = arith.constant 1.250000e-01 : f32
      %61 = vector.broadcast %cst_24 : f32 to vector<1x1xf32>
      %62 = arith.mulf %60, %61 : vector<1x1xf32>
      %63 = vector.shape_cast %62 : vector<1x1xf32> to vector<1x1x1xf32>
      %64 = vector.shape_cast %63 : vector<1x1x1xf32> to vector<1x1x1xf32>
      %65 = vector.broadcast %64 : vector<1x1x1xf32> to vector<1x8x128xf32>
      %c0_25 = arith.constant 0 : index
      %c0_26 = arith.constant 0 : index
      %c0_27 = arith.constant 0 : index
      %66 = vector.load %arg6[%c0_25, %c0_26, %c0_27] : memref<1x8x128xf32, #tpu.memory_space<vmem>>, vector<1x8x128xf32>
      tpu.vector_store %arg6[%c0_25, %c0_26, %c0_27], %65 {strides = array<i32>} : memref<1x8x128xf32, #tpu.memory_space<vmem>>, vector<1x8x128xf32>,
    } else {
    }
    return
  }
  func.func @transform_0(%arg0: i32, %arg1: i32, %arg2: memref<1xf32, #tpu.memory_space<smem>>) -> (i32, i32) {
    %c1_i32 = arith.constant 1 : i32
    %0 = arith.muli %arg0, %c1_i32 : i32
    %1 = arith.addi %0, %arg1 : i32
    %c0_i32 = arith.constant 0 : i32
    %2 = arith.minsi %1, %c0_i32 : i32
    %c0_i32_0 = arith.constant 0 : i32
    %c0_i32_1 = arith.constant 0 : i32
    return %2, %c0_i32_0 : i32, i32
  }
  func.func @transform_1(%arg0: i32, %arg1: i32, %arg2: memref<1xf32, #tpu.memory_space<smem>>) -> (i32, i32) {
    %c1_i32 = arith.constant 1 : i32
    %0 = arith.muli %arg0, %c1_i32 : i32
    %1 = arith.addi %0, %arg1 : i32
    %c0_i32 = arith.constant 0 : i32
    %2 = arith.minsi %1, %c0_i32 : i32
    %c0_i32_0 = arith.constant 0 : i32
    %c0_i32_1 = arith.constant 0 : i32
    return %2, %c0_i32_0 : i32, i32
  }
  func.func @transform_2(%arg0: i32, %arg1: i32, %arg2: memref<1xf32, #tpu.memory_space<smem>>) -> (i32, i32) {
    %c1_i32 = arith.constant 1 : i32
    %0 = arith.muli %arg0, %c1_i32 : i32
    %1 = arith.addi %0, %arg1 : i32
    %c0_i32 = arith.constant 0 : i32
    %2 = arith.minsi %1, %c0_i32 : i32
    %c0_i32_0 = arith.constant 0 : i32
    %c0_i32_1 = arith.constant 0 : i32
    return %2, %c0_i32_0 : i32, i32
  }
  func.func @transform_3(%arg0: i32, %arg1: i32, %arg2: memref<1xf32, #tpu.memory_space<smem>>) -> (i32, i32, i32) {
    %c0_i32 = arith.constant 0 : i32
    %c0_i32_0 = arith.constant 0 : i32
    %c0_i32_1 = arith.constant 0 : i32
    return %arg0, %c0_i32, %c0_i32_0 : i32, i32, i32
  }
}

</mosaic_0001>

<bundles_post_ra>
// kernel: tpu_custom_call.1
= control target key start
LH: loop header
LB: loop body
LE: loop exit
PB: predicated region body
PF: predicated region fallthrough
CT: control target
= control target key end

     0   :  { %vm151_vm0 = vcmask 80896   ;;  %s398_s0 = inlined_call_operand.<no memory space> [shape: f32[1], index: 0, kind: input, shape index: {}]   ;;  %s399_s1 = inlined_call_operand.vmem [shape: f32[8,10], index: 1, kind: input, shape index: {}]   ;;  %s400_s2 = inlined_call_operand.vmem [shape: s32[8,1], index: 2, kind: input, shape index: {}]   ;;  %s401_s3 = inlined_call_operand.vmem [shape: f32[8,10], index: 3, kind: input, shape index: {}]   ;;  %s402_s4 = inlined_call_operand.hbm [shape: f32[1,8,128], index: 4, kind: output, shape index: {}]  }
   0x1   :  { %v149_v0 = vld [vmem:[%s399_s1] sm:$0xff] }
   0x2   :  { %v176_v1 = vld [vmem:[%s400_s2] sm:$0xff] }
   0x3   :  { %10 = vsyncpa [#allocation6], 0  ;;  %v152_v2 = vsel %vm151_vm0, %v149_v0, -inf  ;;  %v342_v3 = vmov 0   ;;  %v178_v7 = vlaneseq  ;;  %v204_v18 = vld [vmem:[%s401_s3] sm:$0xff]  ;;  %v231_v27 = vstv %s398_s0  ;;  %s344_s3 = smov [#allocation5]  }
   0x4   :  { %308 = vset.pattern.permute.xlu1 %v342_v3  ;;  %309 = vset.pattern.permute.xlu0 %v342_v3  ;;  %vm239_vm2 = vcmask 7168   ;;  %vm147_vm3 = vcmask 0   ;;  %v343_v34 = vmov 0.0   ;;  %s277_s21 = sshll.u32 %s344_s3, 4  ;;  %s278_s21 = int_to_ptr.vmem [resolvable:$true] %s277_s21 }
   0x5   :  { %153 = vmax.xlane.f32.xlu0 %v152_v2  ;;  %181 = vperm.xlu1 %308, %v176_v1   ;;  %v179_v8 = vand.u32 127, %v178_v7  ;;  %148 = vst.msk [vmem:[#allocation2] sm:$0x1] %vm147_vm3, %v343_v34  ;;  %v263_v45 = vshrl.u32 %v178_v7, 7  ;;  %s318_s22 = scalar_lea.vmem %s278_s21, 128  ;;  %p323_p1 = scmp.lt.s32.totalorder %s278_s21, %s278_s21 }
   0x6   :  { %p319_p0 = scmp.ne.s32.totalorder %s278_s21, %s318_s22  ;;  %p324_p2 = scmp.lt.s32.totalorder %s318_s22, %s318_s22 }
   0x7   :  { %v264_v46 = vsub.s32 0, %v263_v45 }
   0x8   :  { %p325_p3 = por %p324_p2, %p323_p1 }
   0xa   :  { %p326_p4 = pnand %p325_p3, %p319_p0 }
   0xc   :  { %v238_v42 = vld [vmem:[#allocation2] sm:$0x1] }
  0x84   :  { %v182_v9 = vpop.permute.xlu1 %181 }
  0x85   :  { %vm186_vm1 = vcmp.eq.s32.totalorder %v179_v8, %v182_v9 }
  0x92   :  { %v154_v4 = vpop.xlane.xlu0 %153 }
  0x93   :  { %v158_v5 = vsub.f32 %v149_v0, %v154_v4 }
  0x95   :  { %v160_v6 = vmul.f32 1.442695, %v158_v5  ;;  %v188_v12 = vsel %vm186_vm1, %v158_v5, 0.0 }
  0x96   :  { %v190_v13 = vsel %vm151_vm0, %v188_v12, 0.0 }
  0x97   :  { %310 = vpow2.f32 %v160_v6 }
  0xa1   :  { %v311_v10 = vpop.eup %310 }
  0xa2   :  { %v164_v11 = vsel %vm151_vm0, %v311_v10, 0.0 }
  0xa3   :  { %165 = vadd.xlane.f32.xlu0 %v164_v11 }
  0xa7   :  { %191 = vadd.xlane.f32.xlu0 %v190_v13 }
 0x130   :  { %v166_v14 = vpop.xlane.xlu0 %165 }
 0x131   :  { %312 = vrcp.f32 %v166_v14 }
 0x132   :  { %314 = vlog2.f32 %v166_v14 }
 0x134   :  { %v192_v29 = vpop.xlane.xlu0 %191 }
 0x13b   :  { %v313_v15 = vpop.eup %312 }
 0x13c   :  { %v198_v16 = vmul.f32 %v313_v15, %v311_v10  ;;  %v315_v24 = vpop.eup %314 }
 0x13d   :  { %v173_v25 = vmul.f32 0.6931472, %v315_v24 }
 0x13e   :  { %v200_v17 = vmax.f32 %v198_v16, 0.0001 }
 0x13f   :  { %v196_v30 = vsub.f32 %v173_v25, %v192_v29 }
 0x140   :  { %v202_v19 = vmin.f32 %v200_v17, 0.9999 }
 0x142   :  { %v206_v20 = vmul.f32 %v204_v18, %v202_v19 }
 0x144   :  { %v208_v21 = vsel %vm151_vm0, %v206_v20, 0.0 }
 0x145   :  { %209 = vadd.xlane.f32.xlu1 %v208_v21 }
 0x1d2   :  { %v210_v22 = vpop.xlane.xlu1 %209 }
 0x1d3   :  { %v214_v23 = vsub.f32 1.0, %v210_v22 }
 0x1d5   :  { %316 = vlog2.f32 %v214_v23 }
 0x1df   :  { %v317_v26 = vpop.eup %316 }
 0x1e0   :  { %v217_v28 = vmul.f32 0.6931472, %v317_v26 }
 0x1e2   :  { %v232_v31 = vmul.f32 %v231_v27, %v217_v28 }
 0x1e4   :  { %v234_v32 = vadd.f32 %v232_v31, %v196_v30 }
 0x1e6   :  { %v240_v33 = vsel %vm239_vm2, %v234_v32, 0.0 }
 0x1e7   :  { %243 = vadd.xlane.f32.xlu0 %v240_v33 }
 0x274   :  { %v244_v35 = vpop.xlane.xlu0 %243 }
 0x275   :  { %v245_v36 = vrot.slane %v244_v35, 4 }
 0x277   :  { %v246_v37 = vadd.f32 %v245_v36, %v244_v35 }
 0x279   :  { %v247_v38 = vrot.slane %v246_v37, 2 }
 0x27b   :  { %v248_v39 = vadd.f32 %v247_v38, %v246_v37 }
 0x27d   :  { %v249_v40 = vrot.slane %v248_v39, 1 }
 0x27f   :  { %v250_v41 = vadd.f32 %v249_v40, %v248_v39 }
 0x281   :  { %303 = vpush %v250_v41 }
 0x2b2   :  { %s304_s0 = spop %303 }
 0x2b3   :  { %v252_v43 = vstv %s304_s0 }
 0x2b4   :  { %v253_v44 = vadd.f32 %v252_v43, %v238_v42 }
 0x2b6   :  { %255 = vst.msk [vmem:[#allocation2] sm:$0x1] %vm147_vm3, %v253_v44 }
 0x2bd   :  { %v259_v47 = vld [vmem:[#allocation2] sm:$0x1] }
 0x2be   :  { %v260_v48 = vmul.f32 0.125, %v259_v47 }
 0x2c0   :  { %v265_v49 = vrot.slane %v260_v48, %v264_v46 }
 0x2c2   :  { %267 = vperm.xlu0 %309, %v265_v49  }
 0x341   :  { %v268_v50 = vpop.permute.xlu0 %267 }
 0x342   :  { %270 = vst [vmem:[#allocation5] sm:$0xff] %v268_v50 }
 0x343   :  { %329 = shalt.err (!%p326_p4)
}
 0x344   :  { %s330_s25 = scalar_lea.hbm %s402_s4, 128 }
 0x345   :  { %p331_p5 = scmp.ne.s32.totalorder %s402_s4, %s330_s25  ;;  %p334_p6 = scmp.lt.u32.totalorder %s330_s25, %s402_s4 }
 0x347   :  { %p336_p7 = pnand %p334_p6, %p331_p5 }
 0x349   :  { %339 = shalt.err (!%p336_p7)
}
 0x34a   :  { %280 = dma.vmem_to_hbm [thread:$0]  %s278_s21, 128, %s402_s4, [#allocation6]  }
 0x34b   :  { %340 = dma.done.wait [#allocation6], 128  }
 0x34c   :  { %341 = vsyncadd [#allocation6], 4294967168 }
 0x34d   :  { %284 = vsyncpa [#allocation6], 1 }

</bundles_post_ra>
